<compile_context>
chip_gen: v5e
topology: v5e:2x2
jax: 0.10.0
libtpu: 0.0.40
codegen_flags: <defaults>
</compile_context>

<pallas_src>
import math

import jax
import jax.numpy as jnp
from jax.experimental import pallas as pl
from jax.experimental.pallas import tpu as pltpu


def _build_pe_table(max_seq_len: int, d_model: int) -> jnp.ndarray:
    """Deterministic sinusoidal positional-encoding table [max_seq_len, d_model]."""
    position = jnp.arange(max_seq_len, dtype=jnp.float32)[:, None]            # (L, 1)
    exp_input = jnp.arange(0, d_model, 2, dtype=jnp.float32) * (
        -math.log(10000.0) / d_model
    )                                                                          # (D/2,)
    div_term = jnp.exp(exp_input)                                              # (D/2,)
    angles = position * div_term                                               # (L, D/2)
    pe = jnp.zeros((max_seq_len, d_model), dtype=jnp.float32)
    pe = pe.at[:, 0::2].set(jnp.sin(angles))
    pe = pe.at[:, 1::2].set(jnp.cos(angles))
    return pe


def _pe_add_kernel(x_ref, pe_ref, o_ref):
    # x_ref: (Bt, Ct)   pe_ref: (1, Ct)   o_ref: (Bt, Ct)
    # Plain per-vreg VPU add; (1, Ct) broadcasts over the batch sublanes.
    o_ref[...] = (x_ref[...] + pe_ref[...]).astype(o_ref.dtype)


def _vmem_limit_bytes() -> int:
    """Generation-aware scoped-VMEM limit (headroom under physical capacity)."""
    try:
        cap = int(pltpu.get_tpu_info().vmem_capacity_bytes)
    except Exception:
        cap = 64 << 20  # conservative fallback: v7x has the smallest VMEM (64 MiB/TC)
    # ~75% of physical, capped at 100 MiB (plenty for a streaming add).
    return int(min(cap * 3 // 4, 100 << 20))


def _choose_tiles(b: int, flat: int, itemsize: int, x_block_bytes: int):
    """Pick (bt, ct) for the flattened [b, flat] slab with cdiv (ragged) tiling.

    ct: lane (last-dim) tile, a multiple of 128 (unmasked lane-dense stores),
        or the full axis when the whole row fits the budget (full-dim blocks
        are always legal regardless of 128 alignment).
    bt: batch (sublane) tile, aligned to the dtype's packed sublane granularity
        (8 for f32, 16 for bf16, 32 for int8/fp8), or the full batch.
    """
    packing = max(1, 4 // itemsize)
    sub_align = 8 * packing

    # Lane tile, leaving room for at least `sub_align` rows in the block budget.
    ct_cap = max(128, ((x_block_bytes // (sub_align * itemsize)) // 128) * 128)
    ct = flat if flat <= ct_cap else ct_cap

    # Batch tile within the remaining budget.
    max_rows = max(1, x_block_bytes // (ct * itemsize))
    if b <= max_rows:
        bt = b
    else:
        bt = max(sub_align, (max_rows // sub_align) * sub_align)

    # v7x has 2 TensorCores: if everything collapsed into a single grid step,
    # split one axis so both cores receive work (tiles only shrink -> still in budget).
    if pl.cdiv(flat, ct) * pl.cdiv(b, bt) < 2:
        if flat > 256:
            ct = 128 * max(1, pl.cdiv(pl.cdiv(flat, 2), 128))
        elif b > 2 * sub_align:
            bt = sub_align * max(1, pl.cdiv(pl.cdiv(b, 2), sub_align))
    return bt, ct


def positional_encoder(
    x: jnp.ndarray,
    pe_full: jnp.ndarray,
    *,
    force_pallas: bool = False,
    x_block_bytes: int | None = None,
) -> jnp.ndarray:
    """x: [B, S, D]; pe_full: [max_seq_len, D].  Returns x + pe[:S] (eval-mode dropout)."""
    b, s, d = x.shape
    flat = s * d
    itemsize = jnp.dtype(x.dtype).itemsize

    # Glue: slice pe to the live sequence length, cast to x.dtype, flatten lane-dense.
    pe2 = pe_full[:s, :].astype(x.dtype).reshape(1, flat)
    x2 = x.reshape(b, flat)

    # Tiny inputs: fixed pallas_call / grid / DMA-setup overhead dwarfs the work;
    # the XLA fused add is strictly faster there.
    if not force_pallas and b * flat * itemsize < (1 << 20):
        return (x2 + pe2).reshape(b, s, d)

    vmem_limit = _vmem_limit_bytes()
    if x_block_bytes is None:
        # 2x(in) + 2x(out) double buffers ~= 4 * x_block (+ tiny pe); use ~65% of limit.
        x_block_bytes = max(4 << 10, int(vmem_limit * 0.65) // 4)
    bt, ct = _choose_tiles(b, flat, itemsize, x_block_bytes)

    # Chunk axis OUTER, batch axis INNER: the pe tile index depends only on the
    # outer axis, so it stays resident across the inner batch iterations.
    grid = (pl.cdiv(flat, ct), pl.cdiv(b, bt))

    out = pl.pallas_call(
        _pe_add_kernel,
        out_shape=jax.ShapeDtypeStruct((b, flat), x.dtype),
        grid_spec=pltpu.PrefetchScalarGridSpec(
            num_scalar_prefetch=0,
            grid=grid,
            in_specs=[
                pl.BlockSpec((bt, ct), lambda j, i: (i, j)),   # x tile
                pl.BlockSpec((1, ct), lambda j, i: (0, j)),    # pe tile (shared by batches)
            ],
            out_specs=pl.BlockSpec((bt, ct), lambda j, i: (i, j)),
        ),
        compiler_params=pltpu.CompilerParams(
            dimension_semantics=("parallel", "parallel"),
            vmem_limit_bytes=vmem_limit,
        ),
        input_output_aliases={0: 0},  # donate x (same shape/dtype as the output)
    )(x2, pe2)
    return out.reshape(b, s, d)


if __name__ == "__main__":
    enc_seq_len = 100  # max_seq_len in the reference script

    # Spec-consistent small shapes: [batch, seq, d_model].
    batch, seq, d_model = 2, 8, 32
    key = jax.random.PRNGKey(0)
    x = jax.random.normal(key, (batch, seq, d_model), dtype=jnp.float32)
    pe_full = _build_pe_table(enc_seq_len, d_model)

    out = jax.block_until_ready(positional_encoder(x, pe_full, force_pallas=True))
    ref = x + pe_full[:seq, :][None, :, :]
    assert out.shape == (batch, seq, d_model)
    assert jnp.allclose(out, ref, atol=1e-6), "mismatch vs reference (main shape)"

    # Exercise cdiv ragged tiling: flat = 50*24 = 1200 (not a multiple of 128),
    # tiny block budget forces a masked edge block on the lane axis.
    x_b = jax.random.normal(jax.random.PRNGKey(1), (3, 50, 24), dtype=jnp.float32)
    pe_b = _build_pe_table(enc_seq_len, 24)
    out_b = jax.block_until_ready(
        positional_encoder(x_b, pe_b, force_pallas=True, x_block_bytes=4 << 10)
    )
    ref_b = x_b + pe_b[:50, :][None, :, :]
    assert jnp.allclose(out_b, ref_b, atol=1e-6), "mismatch vs reference (ragged tiling)"

    # bf16 input + tiny-input XLA bypass path.
    x_c = jax.random.normal(jax.random.PRNGKey(2), (2, 8, 32), dtype=jnp.bfloat16)
    out_c = jax.block_until_ready(positional_encoder(x_c, pe_full))
    ref_c = x_c + pe_full[:8, :].astype(jnp.bfloat16)[None, :, :]
    assert jnp.allclose(out_c.astype(jnp.float32), ref_c.astype(jnp.float32), atol=1e-2)

    print("KERNEL_OK")
</pallas_src>

<mosaic_0001>
module attributes {stable_mosaic.version = 11 : i64} {
  func.func @_pe_add_kernel(%arg0: i32, %arg1: i32, %arg2: memref<2x256xf32, #tpu.memory_space<vmem>>, %arg3: memref<1x256xf32, #tpu.memory_space<vmem>>, %arg4: memref<2x256xf32, #tpu.memory_space<vmem>>) attributes {dimension_semantics = [#tpu.dimension_semantics<parallel>, #tpu.dimension_semantics<parallel>], iteration_bounds = array<i64: 1, 1>, scalar_prefetch = 0 : i64, scratch_operands = 0 : i64, tpu.core_type = #tpu.core_type<tc>, window_params = [{transform_indices = @transform_0, window_bounds = array<i64: 2, 256>}, {transform_indices = @transform_1, window_bounds = array<i64: 1, 256>}, {transform_indices = @transform_2, window_bounds = array<i64: 2, 256>}]} {
    %c0 = arith.constant 0 : index
    %c0_0 = arith.constant 0 : index
    %0 = vector.load %arg2[%c0, %c0_0] : memref<2x256xf32, #tpu.memory_space<vmem>>, vector<2x256xf32>
    %c0_1 = arith.constant 0 : index
    %c0_2 = arith.constant 0 : index
    %1 = vector.load %arg3[%c0_1, %c0_2] : memref<1x256xf32, #tpu.memory_space<vmem>>, vector<1x256xf32>
    %2 = vector.broadcast %1 : vector<1x256xf32> to vector<2x256xf32>
    %3 = arith.addf %0, %2 : vector<2x256xf32>
    %c0_3 = arith.constant 0 : index
    %c0_4 = arith.constant 0 : index
    %4 = vector.load %arg4[%c0_3, %c0_4] : memref<2x256xf32, #tpu.memory_space<vmem>>, vector<2x256xf32>
    tpu.vector_store %arg4[%c0_3, %c0_4], %3 {strides = array<i32>} : memref<2x256xf32, #tpu.memory_space<vmem>>, vector<2x256xf32>,
    return
  }
  func.func @transform_0(%arg0: i32, %arg1: i32) -> (i32, i32) {
    %c0_i32 = arith.constant 0 : i32
    return %arg1, %arg0 : i32, i32
  }
  func.func @transform_1(%arg0: i32, %arg1: i32) -> (i32, i32) {
    %c0_i32 = arith.constant 0 : i32
    %c0_i32_0 = arith.constant 0 : i32
    return %c0_i32, %arg0 : i32, i32
  }
  func.func @transform_2(%arg0: i32, %arg1: i32) -> (i32, i32) {
    %c0_i32 = arith.constant 0 : i32
    return %arg1, %arg0 : i32, i32
  }
}

</mosaic_0001>

<bundles_post_ra>
// kernel: tpu_custom_call.1
= control target key start
LH: loop header
LB: loop body
LE: loop exit
PB: predicated region body
PF: predicated region fallthrough
CT: control target
= control target key end

     0   :  { %7 = vsyncpa [#allocation3], 0  ;;  %s134_s0 = inlined_call_operand.hbm [shape: f32[2,256], index: 0, kind: input, shape index: {}, may-alias: {0,2}]   ;;  %s135_s1 = inlined_call_operand.vmem [shape: f32[1,256], index: 1, kind: input, shape index: {}]   ;;  %s136_s2 = inlined_call_operand.hbm [shape: f32[2,256], index: 2, kind: output, shape index: {}, may-alias: {0,2}]  }
   0x1   :  { %8 = vsyncpa [#allocation4], 0  ;;  %s14_s11 = sshll.u32 %s134_s0, 4  ;;  %s108_s12 = smov [#allocation2]   ;;  %s15_s11 = int_to_ptr.hbm [resolvable:$true] %s14_s11 }
   0x2   :  { %s16_s13 = sshll.u32 %s108_s12, 4  ;;  %s17_s13 = int_to_ptr.vmem [resolvable:$true] %s16_s13 }
   0x3   :  { %19 = dma.hbm_to_vmem [thread:$0]  %s15_s11, 64, %s17_s13, [#allocation3]  }
   0x4   :  { %104 = dma.done.wait [#allocation3], 64  }
   0x5   :  { %105 = vsyncadd [#allocation3], 4294967232  ;;  %v27_v0 = vld [vmem:[%s135_s1] sm:$0x3]  ;;  %vm32_vm0 = vcmask 1041408   ;;  %s109_s16 = smov [#allocation5]  }
   0x6   :  { %v29_v1 = vperm.slane %v27_v0, 0  ;;  %v30_v2 = vperm.slane %v27_v0, 1  ;;  %v26_v3 = vld [vmem:[#allocation2] sm:$0xf]  ;;  %s42_s17 = sshll.u32 %s109_s16, 4  ;;  %s44_s19 = sshll.u32 %s136_s2, 4  ;;  %s43_s17 = int_to_ptr.vmem [resolvable:$true] %s42_s17  ;;  %s45_s19 = int_to_ptr.hbm [resolvable:$true] %s44_s19 }
   0x8   :  { %v31_v4 = vrot.slane %v30_v2, 6 }
   0xa   :  { %v33_v5 = vsel %vm32_vm0, %v29_v1, %v31_v4 }
   0xb   :  { %v35_v6 = vadd.f32 %v33_v5, %v26_v3 }
   0xd   :  { %36 = vst [vmem:[#allocation5] sm:$0xf] %v35_v6 }
   0xe   :  { %47 = dma.vmem_to_hbm [thread:$0]  %s43_s17, 64, %s45_s19, [#allocation4]  }
   0xf   :  { %106 = dma.done.wait [#allocation4], 64  }
  0x10   :  { %107 = vsyncadd [#allocation4], 4294967232 }
  0x11   :  { %52 = vsyncpa [#allocation3], 1 }
  0x12   :  { %53 = vsyncpa [#allocation4], 1 }

</bundles_post_ra>
